<compile_context>
chip_gen: v7x
topology: tpu7x:2x2x1
jax: 0.10.0
libtpu: 0.0.40
codegen_flags: <defaults>
</compile_context>

<pallas_src>
import math
import functools

import jax
import jax.numpy as jnp
from jax.experimental import pallas as pl
from jax.experimental.pallas import tpu as pltpu


# Tile caps: worst case (f32, tm=256, tn=512, tk=2048) double-buffered is
# ~22 MiB of VMEM -> safe on v7x (64 MiB physical) and v5e/v6e.
_TM_CAP = 256
_TN_CAP = 512
_TK_CAP = 2048
_VMEM_LIMIT = 40 * 1024 * 1024


# ---------------------------------------------------------------------------
# Helpers
# ---------------------------------------------------------------------------
def _round_up(x, m):
    return ((x + m - 1) // m) * m


def _pick_tile(dim, align, cap):
    """Pick the tile first, then pad: choose the aligned tile <= cap that
    minimizes the padded dim (tie-break: the larger tile)."""
    hi = min(cap, _round_up(dim, align))
    best_t, best_pad = align, _round_up(dim, align)
    for t in range(align, hi + 1, align):
        pad = _round_up(dim, t)
        if (pad, -t) < (best_pad, -best_t):
            best_t, best_pad = t, pad
    return best_t, best_pad


def _pad2(a, rows, cols):
    pr, pc = rows - a.shape[0], cols - a.shape[1]
    if pr or pc:
        a = jnp.pad(a, ((0, pr), (0, pc)))
    return a


# ---------------------------------------------------------------------------
# Kernels
# ---------------------------------------------------------------------------
def _noisy_train_kernel(x_ref, wmu_ref, wsig_ref, ein_ref, eout_ref, b_ref,
                        o_ref, acc_mu_ref, acc_sig_ref):
    """y = x @ W_mu^T + ((x * e_in) @ W_sigma^T) * e_out + b_noisy."""
    k = pl.program_id(2)

    @pl.when(k == 0)
    def _init():
        acc_mu_ref[...] = jnp.zeros_like(acc_mu_ref)
        acc_sig_ref[...] = jnp.zeros_like(acc_sig_ref)

    xv = x_ref[...]                      # (tm, tk)
    xe = xv * ein_ref[...]               # rank-1 epsilon: scale x by e_in

    # Contract the K axis of x (tm, tk) with the K axis of w (tn, tk):
    # weight stays in PyTorch (N, K) layout, no transpose materialized.
    dn = (((1,), (1,)), ((), ()))
    acc_mu_ref[...] += jax.lax.dot_general(
        xv, wmu_ref[...], dn, preferred_element_type=jnp.float32)
    acc_sig_ref[...] += jax.lax.dot_general(
        xe, wsig_ref[...], dn, preferred_element_type=jnp.float32)

    @pl.when(k == pl.num_programs(2) - 1)
    def _finalize():
        o_ref[...] = (acc_mu_ref[...]
                      + acc_sig_ref[...] * eout_ref[...]
                      + b_ref[...]).astype(o_ref.dtype)


def _eval_kernel(x_ref, w_ref, b_ref, o_ref, acc_ref):
    """y = x @ W_mu^T + b_mu."""
    k = pl.program_id(2)

    @pl.when(k == 0)
    def _init():
        acc_ref[...] = jnp.zeros_like(acc_ref)

    dn = (((1,), (1,)), ((), ()))
    acc_ref[...] += jax.lax.dot_general(
        x_ref[...], w_ref[...], dn, preferred_element_type=jnp.float32)

    @pl.when(k == pl.num_programs(2) - 1)
    def _finalize():
        o_ref[...] = (acc_ref[...] + b_ref[...]).astype(o_ref.dtype)


# ---------------------------------------------------------------------------
# Layer factory: prepare_params (run once per param/noise update) + forward
# ---------------------------------------------------------------------------
def make_noisy_linear(in_features, out_features, *, use_bf16=False):
    N, K = out_features, in_features
    mm_dtype = jnp.bfloat16 if use_bf16 else jnp.float32

    tk, K_pad = _pick_tile(K, 128, _TK_CAP)

    # v7x has 2 TensorCores: with one batch tile the only parallel multiplicity
    # is N_pad/tn, so cap tn to give >= 2 N-tiles whenever possible.
    n128 = _round_up(N, 128)
    if n128 >= 256:
        tn_cap = min(_TN_CAP, max(128, (n128 // 2) // 128 * 128))
    else:
        tn_cap = _TN_CAP
    tn, N_pad = _pick_tile(N, 128, tn_cap)

    def prepare_params(params):
        """Pad / cast parameters once (init, reset_noise, optimizer step)."""
        wmu = _pad2(params["weight_mu"], N_pad, K_pad).astype(mm_dtype)
        wsig = _pad2(params["weight_sigma"], N_pad, K_pad).astype(mm_dtype)
        ein = _pad2(params["eps_in"].reshape(1, K), 1, K_pad).astype(mm_dtype)
        eout = _pad2(params["eps_out"].reshape(1, N), 1, N_pad).astype(jnp.float32)
        b_eval = _pad2(params["bias_mu"].reshape(1, N), 1, N_pad).astype(jnp.float32)
        b_noisy = params["bias_mu"] + params["bias_sigma"] * params["bias_epsilon"]
        b_train = _pad2(b_noisy.reshape(1, N), 1, N_pad).astype(jnp.float32)
        return {"wmu": wmu, "wsig": wsig, "ein": ein, "eout": eout,
                "b_train": b_train, "b_eval": b_eval}

    @functools.partial(jax.jit, static_argnames=("training",))
    def forward(x, prep, training=True):
        B = x.shape[0]
        tm, B_pad = _pick_tile(B, 8, _TM_CAP)
        x_p = _pad2(x, B_pad, K_pad).astype(mm_dtype)

        grid = (B_pad // tm, N_pad // tn, K_pad // tk)
        itemsize = jnp.dtype(mm_dtype).itemsize
        n_tiles = N_pad // tn
        b_tiles = B_pad // tm

        x_spec = pl.BlockSpec((tm, tk), lambda i, j, k: (i, k))
        w_spec = pl.BlockSpec((tn, tk), lambda i, j, k: (j, k))
        vecn_spec = pl.BlockSpec((1, tn), lambda i, j, k: (0, j))
        veck_spec = pl.BlockSpec((1, tk), lambda i, j, k: (0, k))
        out_spec = pl.BlockSpec((tm, tn), lambda i, j, k: (i, j))
        out_shape = jax.ShapeDtypeStruct((B_pad, N_pad), jnp.float32)
        cparams = pltpu.CompilerParams(
            dimension_semantics=("parallel", "parallel", "arbitrary"),
            vmem_limit_bytes=_VMEM_LIMIT)

        if training:
            cost = pl.CostEstimate(
                flops=4 * B_pad * K_pad * N_pad, transcendentals=0,
                bytes_accessed=(itemsize * (2 * N_pad * K_pad * b_tiles
                                            + B_pad * K_pad * n_tiles)
                                + 4 * B_pad * N_pad))
            y_pad = pl.pallas_call(
                _noisy_train_kernel,
                grid=grid,
                in_specs=[x_spec, w_spec, w_spec, veck_spec, vecn_spec,
                          vecn_spec],
                out_specs=out_spec,
                out_shape=out_shape,
                scratch_shapes=[pltpu.VMEM((tm, tn), jnp.float32),
                                pltpu.VMEM((tm, tn), jnp.float32)],
                compiler_params=cparams,
                cost_estimate=cost,
            )(x_p, prep["wmu"], prep["wsig"], prep["ein"], prep["eout"],
              prep["b_train"])
        else:
            cost = pl.CostEstimate(
                flops=2 * B_pad * K_pad * N_pad, transcendentals=0,
                bytes_accessed=(itemsize * (N_pad * K_pad * b_tiles
                                            + B_pad * K_pad * n_tiles)
                                + 4 * B_pad * N_pad))
            y_pad = pl.pallas_call(
                _eval_kernel,
                grid=grid,
                in_specs=[x_spec, w_spec, vecn_spec],
                out_specs=out_spec,
                out_shape=out_shape,
                scratch_shapes=[pltpu.VMEM((tm, tn), jnp.float32)],
                compiler_params=cparams,
                cost_estimate=cost,
            )(x_p, prep["wmu"], prep["b_eval"])

        return y_pad[:B, :N].astype(x.dtype)

    return prepare_params, forward


# ---------------------------------------------------------------------------
# Deterministic parameter / noise initialization (mirrors PyTorch __init__,
# reset_parameters, reset_noise with factorized noise).
# ---------------------------------------------------------------------------
def init_noisy_linear(key, in_features, out_features, std_init=0.5):
    k_wmu, k_bmu, k_ein, k_eout = jax.random.split(key, 4)
    mu_range = 1.0 / math.sqrt(in_features)

    def scale_noise(k, size):
        v = jax.random.normal(k, (size,), jnp.float32)
        return jnp.sign(v) * jnp.sqrt(jnp.abs(v))

    eps_in = scale_noise(k_ein, in_features)
    eps_out = scale_noise(k_eout, out_features)

    return {
        "weight_mu": jax.random.uniform(k_wmu, (out_features, in_features),
                                        jnp.float32, -mu_range, mu_range),
        "weight_sigma": jnp.full((out_features, in_features),
                                 std_init / math.sqrt(in_features),
                                 jnp.float32),
        "bias_mu": jax.random.uniform(k_bmu, (out_features,), jnp.float32,
                                      -mu_range, mu_range),
        "bias_sigma": jnp.full((out_features,),
                               std_init / math.sqrt(out_features),
                               jnp.float32),
        # Factorized noise factors: weight_epsilon == outer(eps_out, eps_in),
        # bias_epsilon == eps_out (exactly what the PyTorch module produces).
        "eps_in": eps_in,
        "eps_out": eps_out,
        "bias_epsilon": eps_out,
    }


# ---------------------------------------------------------------------------
# Reference (plain JAX) for correctness check
# ---------------------------------------------------------------------------
def noisy_linear_ref(x, p, training=True):
    if training:
        w_eps = jnp.outer(p["eps_out"], p["eps_in"])
        w = p["weight_mu"] + p["weight_sigma"] * w_eps
        b = p["bias_mu"] + p["bias_sigma"] * p["bias_epsilon"]
    else:
        w, b = p["weight_mu"], p["bias_mu"]
    return x @ w.T + b


if __name__ == "__main__":
    key = jax.random.PRNGKey(0)

    # Case 1: tiny shapes (out < 128 exercises lane-dense padding).
    # Case 2: multi-N-tile grid (N_pad=384 -> 3 parallel N steps).
    # Case 3: multi-K-tile reduction (K_pad=2560 -> 2 K steps) + 2 N tiles.
    cases = [(8, 32, 64), (16, 1024, 384), (8, 2560, 256)]

    for idx, (B, IN, OUT) in enumerate(cases):
        kp, kx = jax.random.split(jax.random.fold_in(key, idx))
        p = init_noisy_linear(kp, IN, OUT, std_init=0.5)
        x = jax.random.normal(kx, (B, IN), jnp.float32)

        prepare_params, forward = make_noisy_linear(IN, OUT, use_bf16=False)
        prep = prepare_params(p)

        y_tr = forward(x, prep, training=True)
        y_ev = forward(x, prep, training=False)
        jax.block_until_ready((y_tr, y_ev))

        r_tr = noisy_linear_ref(x, p, training=True)
        r_ev = noisy_linear_ref(x, p, training=False)

        assert y_tr.shape == r_tr.shape and y_ev.shape == r_ev.shape
        assert jnp.allclose(y_tr, r_tr, atol=2e-4, rtol=1e-5), \
            float(jnp.max(jnp.abs(y_tr - r_tr)))
        assert jnp.allclose(y_ev, r_ev, atol=2e-4, rtol=1e-5), \
            float(jnp.max(jnp.abs(y_ev - r_ev)))

    # TODO(synk): flip use_bf16=True on v6e/v7x if the RL training loop
    # tolerates bf16 matmul operands (accumulation stays f32; weights are
    # cast at prepare_params time, halving weight HBM traffic).
    print("KERNEL_OK")
</pallas_src>

<mosaic_0001>
module attributes {stable_mosaic.version = 11 : i64} {
  func.func @_noisy_train_kernel(%arg0: i32, %arg1: i32, %arg2: i32, %arg3: memref<8x128xf32, #tpu.memory_space<vmem>>, %arg4: memref<128x128xf32, #tpu.memory_space<vmem>>, %arg5: memref<128x128xf32, #tpu.memory_space<vmem>>, %arg6: memref<1x128xf32, #tpu.memory_space<vmem>>, %arg7: memref<1x128xf32, #tpu.memory_space<vmem>>, %arg8: memref<1x128xf32, #tpu.memory_space<vmem>>, %arg9: memref<8x128xf32, #tpu.memory_space<vmem>>, %arg10: memref<8x128xf32, #tpu.memory_space<vmem>>, %arg11: memref<8x128xf32, #tpu.memory_space<vmem>>) attributes {dimension_semantics = [#tpu.dimension_semantics<parallel>, #tpu.dimension_semantics<parallel>, #tpu.dimension_semantics<arbitrary>], iteration_bounds = array<i64: 1, 1, 1>, scalar_prefetch = 0 : i64, scratch_operands = 2 : i64, tpu.core_type = #tpu.core_type<tc>, window_params = [{transform_indices = @transform_0, window_bounds = array<i64: 8, 128>}, {transform_indices = @transform_1, window_bounds = array<i64: 128, 128>}, {transform_indices = @transform_2, window_bounds = array<i64: 128, 128>}, {transform_indices = @transform_3, window_bounds = array<i64: 1, 128>}, {transform_indices = @transform_4, window_bounds = array<i64: 1, 128>}, {transform_indices = @transform_5, window_bounds = array<i64: 1, 128>}, {transform_indices = @transform_6, window_bounds = array<i64: 8, 128>}]} {
    %c0_i32 = arith.constant 0 : i32
    %0 = arith.cmpi eq, %arg2, %c0_i32 : i32
    %1 = arith.extui %0 : i1 to i32
    %c0_i32_0 = arith.constant 0 : i32
    %2 = arith.cmpi ne, %1, %c0_i32_0 : i32
    scf.if %2 {
      %cst_19 = arith.constant 0.000000e+00 : f32
      %20 = vector.broadcast %cst_19 : f32 to vector<8x128xf32>
      %c0_20 = arith.constant 0 : index
      %c0_21 = arith.constant 0 : index
      %21 = vector.load %arg10[%c0_20, %c0_21] : memref<8x128xf32, #tpu.memory_space<vmem>>, vector<8x128xf32>
      tpu.vector_store %arg10[%c0_20, %c0_21], %20 {strides = array<i32>} : memref<8x128xf32, #tpu.memory_space<vmem>>, vector<8x128xf32>,
      %cst_22 = arith.constant 0.000000e+00 : f32
      %22 = vector.broadcast %cst_22 : f32 to vector<8x128xf32>
      %c0_23 = arith.constant 0 : index
      %c0_24 = arith.constant 0 : index
      %23 = vector.load %arg11[%c0_23, %c0_24] : memref<8x128xf32, #tpu.memory_space<vmem>>, vector<8x128xf32>
      tpu.vector_store %arg11[%c0_23, %c0_24], %22 {strides = array<i32>} : memref<8x128xf32, #tpu.memory_space<vmem>>, vector<8x128xf32>,
    } else {
    }
    %c0 = arith.constant 0 : index
    %c0_1 = arith.constant 0 : index
    %3 = vector.load %arg3[%c0, %c0_1] : memref<8x128xf32, #tpu.memory_space<vmem>>, vector<8x128xf32>
    %c0_2 = arith.constant 0 : index
    %c0_3 = arith.constant 0 : index
    %4 = vector.load %arg6[%c0_2, %c0_3] : memref<1x128xf32, #tpu.memory_space<vmem>>, vector<1x128xf32>
    %5 = vector.broadcast %4 : vector<1x128xf32> to vector<8x128xf32>
    %6 = arith.mulf %3, %5 : vector<8x128xf32>
    %c0_4 = arith.constant 0 : index
    %c0_5 = arith.constant 0 : index
    %7 = vector.load %arg10[%c0_4, %c0_5] : memref<8x128xf32, #tpu.memory_space<vmem>>, vector<8x128xf32>
    %c0_6 = arith.constant 0 : index
    %c0_7 = arith.constant 0 : index
    %8 = vector.load %arg4[%c0_6, %c0_7] : memref<128x128xf32, #tpu.memory_space<vmem>>, vector<128x128xf32>
    %cst = arith.constant dense<0.000000e+00> : vector<8x128xf32>
    %9 = tpu.matmul %3, %8, %cst {dimension_numbers = #tpu.dot_dimension_numbers<[1], [1], [0], [0], [0, 0, 1, 0], [], []>} : vector<8x128xf32>, vector<128x128xf32>, vector<8x128xf32> -> vector<8x128xf32>
    %10 = arith.addf %7, %9 : vector<8x128xf32>
    %c0_8 = arith.constant 0 : index
    %c0_9 = arith.constant 0 : index
    %11 = vector.load %arg10[%c0_8, %c0_9] : memref<8x128xf32, #tpu.memory_space<vmem>>, vector<8x128xf32>
    tpu.vector_store %arg10[%c0_8, %c0_9], %10 {strides = array<i32>} : memref<8x128xf32, #tpu.memory_space<vmem>>, vector<8x128xf32>,
    %c0_10 = arith.constant 0 : index
    %c0_11 = arith.constant 0 : index
    %12 = vector.load %arg11[%c0_10, %c0_11] : memref<8x128xf32, #tpu.memory_space<vmem>>, vector<8x128xf32>
    %c0_12 = arith.constant 0 : index
    %c0_13 = arith.constant 0 : index
    %13 = vector.load %arg5[%c0_12, %c0_13] : memref<128x128xf32, #tpu.memory_space<vmem>>, vector<128x128xf32>
    %cst_14 = arith.constant dense<0.000000e+00> : vector<8x128xf32>
    %14 = tpu.matmul %6, %13, %cst_14 {dimension_numbers = #tpu.dot_dimension_numbers<[1], [1], [0], [0], [0, 0, 1, 0], [], []>} : vector<8x128xf32>, vector<128x128xf32>, vector<8x128xf32> -> vector<8x128xf32>
    %15 = arith.addf %12, %14 : vector<8x128xf32>
    %c0_15 = arith.constant 0 : index
    %c0_16 = arith.constant 0 : index
    %16 = vector.load %arg11[%c0_15, %c0_16] : memref<8x128xf32, #tpu.memory_space<vmem>>, vector<8x128xf32>
    tpu.vector_store %arg11[%c0_15, %c0_16], %15 {strides = array<i32>} : memref<8x128xf32, #tpu.memory_space<vmem>>, vector<8x128xf32>,
    %c0_i32_17 = arith.constant 0 : i32
    %17 = arith.cmpi eq, %arg2, %c0_i32_17 : i32
    %18 = arith.extui %17 : i1 to i32
    %c0_i32_18 = arith.constant 0 : i32
    %19 = arith.cmpi ne, %18, %c0_i32_18 : i32
    scf.if %19 {
      %c0_19 = arith.constant 0 : index
      %c0_20 = arith.constant 0 : index
      %20 = vector.load %arg10[%c0_19, %c0_20] : memref<8x128xf32, #tpu.memory_space<vmem>>, vector<8x128xf32>
      %c0_21 = arith.constant 0 : index
      %c0_22 = arith.constant 0 : index
      %21 = vector.load %arg11[%c0_21, %c0_22] : memref<8x128xf32, #tpu.memory_space<vmem>>, vector<8x128xf32>
      %c0_23 = arith.constant 0 : index
      %c0_24 = arith.constant 0 : index
      %22 = vector.load %arg7[%c0_23, %c0_24] : memref<1x128xf32, #tpu.memory_space<vmem>>, vector<1x128xf32>
      %23 = vector.broadcast %22 : vector<1x128xf32> to vector<8x128xf32>
      %24 = arith.mulf %21, %23 : vector<8x128xf32>
      %25 = arith.addf %20, %24 : vector<8x128xf32>
      %c0_25 = arith.constant 0 : index
      %c0_26 = arith.constant 0 : index
      %26 = vector.load %arg8[%c0_25, %c0_26] : memref<1x128xf32, #tpu.memory_space<vmem>>, vector<1x128xf32>
      %27 = vector.broadcast %26 : vector<1x128xf32> to vector<8x128xf32>
      %28 = arith.addf %25, %27 : vector<8x128xf32>
      %c0_27 = arith.constant 0 : index
      %c0_28 = arith.constant 0 : index
      %29 = vector.load %arg9[%c0_27, %c0_28] : memref<8x128xf32, #tpu.memory_space<vmem>>, vector<8x128xf32>
      tpu.vector_store %arg9[%c0_27, %c0_28], %28 {strides = array<i32>} : memref<8x128xf32, #tpu.memory_space<vmem>>, vector<8x128xf32>,
    } else {
    }
    return
  }
  func.func @transform_0(%arg0: i32, %arg1: i32, %arg2: i32) -> (i32, i32) {
    %c0_i32 = arith.constant 0 : i32
    return %arg0, %arg2 : i32, i32
  }
  func.func @transform_1(%arg0: i32, %arg1: i32, %arg2: i32) -> (i32, i32) {
    %c0_i32 = arith.constant 0 : i32
    return %arg1, %arg2 : i32, i32
  }
  func.func @transform_2(%arg0: i32, %arg1: i32, %arg2: i32) -> (i32, i32) {
    %c0_i32 = arith.constant 0 : i32
    return %arg1, %arg2 : i32, i32
  }
  func.func @transform_3(%arg0: i32, %arg1: i32, %arg2: i32) -> (i32, i32) {
    %c0_i32 = arith.constant 0 : i32
    %c0_i32_0 = arith.constant 0 : i32
    return %c0_i32, %arg2 : i32, i32
  }
  func.func @transform_4(%arg0: i32, %arg1: i32, %arg2: i32) -> (i32, i32) {
    %c0_i32 = arith.constant 0 : i32
    %c0_i32_0 = arith.constant 0 : i32
    return %c0_i32, %arg1 : i32, i32
  }
  func.func @transform_5(%arg0: i32, %arg1: i32, %arg2: i32) -> (i32, i32) {
    %c0_i32 = arith.constant 0 : i32
    %c0_i32_0 = arith.constant 0 : i32
    return %c0_i32, %arg1 : i32, i32
  }
  func.func @transform_6(%arg0: i32, %arg1: i32, %arg2: i32) -> (i32, i32) {
    %c0_i32 = arith.constant 0 : i32
    return %arg0, %arg1 : i32, i32
  }
}

</mosaic_0001>

<bundles_post_ra>
// kernel: forward.1
= control target key start
LH: loop header
LB: loop body
LE: loop exit
PB: predicated region body
PF: predicated region fallthrough
CT: control target
= control target key end

     0   :  { %11 = vsyncpa [#allocation5], 0  ;;  %s626_s0 = inlined_call_operand.vmem [shape: f32[8,128], index: 0, kind: input, shape index: {}]   ;;  %s627_s1 = inlined_call_operand.hbm [shape: f32[128,128], index: 1, kind: input, shape index: {}]   ;;  %s628_s2 = inlined_call_operand.hbm [shape: f32[128,128], index: 2, kind: input, shape index: {}]   ;;  %s629_s3 = inlined_call_operand.vmem [shape: f32[1,128], index: 3, kind: input, shape index: {}]   ;;  %s630_s4 = inlined_call_operand.vmem [shape: f32[1,128], index: 4, kind: input, shape index: {}]   ;;  %s631_s5 = inlined_call_operand.vmem [shape: f32[1,128], index: 5, kind: input, shape index: {}]   ;;  %s632_s6 = inlined_call_operand.hbm [shape: f32[8,128], index: 6, kind: output, shape index: {}]  }
   0x1   :  { %12 = vsyncpa [#allocation8], 0 }
   0x2   :  { %13 = vsyncpa [#allocation6], 0  ;;  %s519_s21 = smov [#allocation4]   ;;  %s447_s25 = scalar_lea.hbm %s627_s1, 2048 }
   0x3   :  { %s21_s22 = sshll.u32 %s519_s21, 4  ;;  %p448_p0 = scmp.ne.s32.totalorder %s627_s1, %s447_s25  ;;  %s22_s22 = int_to_ptr.vmem [resolvable:$true] %s21_s22 }
   0x4   :  { %p451_p1 = scmp.lt.u32.totalorder %s447_s25, %s627_s1 }
   0x6   :  { %p453_p2 = pnand %p451_p1, %p448_p0 }
   0x8   :  { %456 = shalt.err (!%p453_p2)
}
   0x9   :  { %s457_s30 = scalar_lea.vmem %s22_s22, 2048  ;;  %p462_p4 = scmp.lt.s32.totalorder %s22_s22, %s22_s22 }
   0xa   :  { %p458_p3 = scmp.ne.s32.totalorder %s22_s22, %s457_s30  ;;  %p463_p5 = scmp.lt.s32.totalorder %s457_s30, %s457_s30 }
   0xc   :  { %p464_p6 = por %p463_p5, %p462_p4 }
   0xe   :  { %p465_p7 = pnand %p464_p6, %p458_p3 }
  0x10   :  { %468 = shalt.err (!%p465_p7)
}
  0x11   :  { %s520_s7 = smov 128   ;;  %s521_s8 = smov 8  }
  0x12   :  { %27 = dma.hbm_to_vmem [thread:$0]  %s627_s1, 2048, %s22_s22, [#allocation5], %s520_s7, %s520_s7, %s521_s8  }
  0x13   :  { %s522_s11 = smov [#allocation7]   ;;  %s469_s15 = scalar_lea.hbm %s628_s2, 2048 }
  0x14   :  { %s33_s12 = sshll.u32 %s522_s11, 4  ;;  %p470_p8 = scmp.ne.s32.totalorder %s628_s2, %s469_s15  ;;  %s34_s12 = int_to_ptr.vmem [resolvable:$true] %s33_s12 }
  0x15   :  { %p473_p9 = scmp.lt.u32.totalorder %s469_s15, %s628_s2 }
  0x17   :  { %p475_p10 = pnand %p473_p9, %p470_p8 }
  0x19   :  { %478 = shalt.err (!%p475_p10)
}
  0x1a   :  { %s479_s20 = scalar_lea.vmem %s34_s12, 2048  ;;  %p484_p12 = scmp.lt.s32.totalorder %s34_s12, %s34_s12 }
  0x1b   :  { %p480_p11 = scmp.ne.s32.totalorder %s34_s12, %s479_s20  ;;  %p485_p13 = scmp.lt.s32.totalorder %s479_s20, %s479_s20 }
  0x1d   :  { %p486_p0 = por %p485_p13, %p484_p12 }
  0x1f   :  { %p487_p1 = pnand %p486_p0, %p480_p11 }
  0x21   :  { %490 = shalt.err (!%p487_p1)
}
  0x22   :  { %39 = dma.hbm_to_vmem [thread:$0]  %s628_s2, 2048, %s34_s12, [#allocation8], %s520_s7, %s520_s7, %s521_s8  }
  0x23   :  { %513 = dma.done.wait [#allocation5], 2048  }
  0x24   :  { %514 = vsyncadd [#allocation5], 4294965248 }
  0x25   :  { %515 = dma.done.wait [#allocation8], 2048  }
  0x26   :  { %516 = vsyncadd [#allocation8], 4294965248  ;;  %v523_v0 = vmov 0.0|0.0   ;;  %vm524_vm0 = vmmov 0   ;;  %v525_v1 = vmov 0.0   ;;  %v157_v2 = vld [vmem:[#allocation7] sm:$0xff] }
  0x27   :  { %415 = vmatprep.subr.bf16.mxu1 %v523_v0  ;;  %391 = vmatprep.subr.bf16.mxu0 %v523_v0  ;;  %v158_v3 = vld [vmem:[#allocation7 + $0x8] sm:$0xff]  ;;  %v68_v4 = vld [vmem:[#allocation4] sm:$0xff]  ;;  %v159_v8 = vld [vmem:[#allocation7 + $0x10] sm:$0xff] }
  0x28   :  { %388 = vmatprep.mubr.msk.f32.mxu1 %vm524_vm0, %v525_v1  ;;  %353 = vmatprep.mubr.msk.f32.mxu0 %vm524_vm0, %v525_v1  ;;  %v416_v5 = vpack.c.bf16 %v158_v3, %v157_v2  ;;  %v69_v6 = vld [vmem:[#allocation4 + $0x8] sm:$0xff]  ;;  %v160_v9 = vld [vmem:[#allocation7 + $0x18] sm:$0xff]  ;;  %v70_v10 = vld [vmem:[#allocation4 + $0x10] sm:$0xff] }
  0x29   :  { %v392_v7 = vpack.c.bf16 %v69_v6, %v68_v4  ;;  %v71_v11 = vld [vmem:[#allocation4 + $0x18] sm:$0xff]  ;;  %v419_v12 = vpack.c.bf16 %v160_v9, %v159_v8  ;;  %v161_v14 = vld [vmem:[#allocation7 + $0x20] sm:$0xff]  ;;  %v162_v15 = vld [vmem:[#allocation7 + $0x28] sm:$0xff] }
  0x2a   :  { %417 = vmatpush3.bf16.xpose.msra.mxu1 %v416_v5  ;;  %v395_v13 = vpack.c.bf16 %v71_v11, %v70_v10  ;;  %v72_v16 = vld [vmem:[#allocation4 + $0x20] sm:$0xff]  ;;  %v73_v17 = vld [vmem:[#allocation4 + $0x28] sm:$0xff]  ;;  %v422_v18 = vpack.c.bf16 %v162_v15, %v161_v14  ;;  %v163_v20 = vld [vmem:[#allocation7 + $0x30] sm:$0xff] }
  0x2b   :  { %393 = vmatpush3.bf16.xpose.msra.mxu0 %v392_v7  ;;  %418 = vmatprep.subr.bf16.mxu1 %v523_v0  ;;  %v398_v19 = vpack.c.bf16 %v73_v17, %v72_v16  ;;  %v164_v21 = vld [vmem:[#allocation7 + $0x38] sm:$0xff]  ;;  %v74_v22 = vld [vmem:[#allocation4 + $0x30] sm:$0xff]  ;;  %v165_v26 = vld [vmem:[#allocation7 + $0x40] sm:$0xff] }
  0x2c   :  { %394 = vmatprep.subr.bf16.mxu0 %v523_v0  ;;  %v75_v23 = vld [vmem:[#allocation4 + $0x38] sm:$0xff]  ;;  %v425_v24 = vpack.c.bf16 %v164_v21, %v163_v20  ;;  %v166_v27 = vld [vmem:[#allocation7 + $0x48] sm:$0xff]  ;;  %v76_v28 = vld [vmem:[#allocation4 + $0x40] sm:$0xff] }
  0x2d   :  { %v401_v25 = vpack.c.bf16 %v75_v23, %v74_v22  ;;  %v77_v29 = vld [vmem:[#allocation4 + $0x48] sm:$0xff]  ;;  %v428_v30 = vpack.c.bf16 %v166_v27, %v165_v26  ;;  %v167_v32 = vld [vmem:[#allocation7 + $0x50] sm:$0xff]  ;;  %v168_v33 = vld [vmem:[#allocation7 + $0x58] sm:$0xff] }
  0x2e   :  { %v404_v31 = vpack.c.bf16 %v77_v29, %v76_v28  ;;  %v78_v34 = vld [vmem:[#allocation4 + $0x50] sm:$0xff]  ;;  %v79_v35 = vld [vmem:[#allocation4 + $0x58] sm:$0xff]  ;;  %v431_v36 = vpack.c.bf16 %v168_v33, %v167_v32  ;;  %v169_v38 = vld [vmem:[#allocation7 + $0x60] sm:$0xff] }
  0x2f   :  { %v407_v37 = vpack.c.bf16 %v79_v35, %v78_v34  ;;  %v170_v39 = vld [vmem:[#allocation7 + $0x68] sm:$0xff]  ;;  %v80_v40 = vld [vmem:[#allocation4 + $0x60] sm:$0xff]  ;;  %v171_v44 = vld [vmem:[#allocation7 + $0x70] sm:$0xff] }
  0x30   :  { %v81_v41 = vld [vmem:[#allocation4 + $0x68] sm:$0xff]  ;;  %v434_v42 = vpack.c.bf16 %v170_v39, %v169_v38  ;;  %v172_v45 = vld [vmem:[#allocation7 + $0x78] sm:$0xff]  ;;  %v82_v46 = vld [vmem:[#allocation4 + $0x70] sm:$0xff] }
  0x31   :  { %v410_v43 = vpack.c.bf16 %v81_v41, %v80_v40  ;;  %v83_v47 = vld [vmem:[#allocation4 + $0x78] sm:$0xff]  ;;  %v437_v48 = vpack.c.bf16 %v172_v45, %v171_v44 }
  0x32   :  { %420 = vmatpush3.bf16.xpose.msra.mxu1 %v419_v12  ;;  %v413_v49 = vpack.c.bf16 %v83_v47, %v82_v46  ;;  %v58_v50 = vld [vmem:[%s626_s0] sm:$0xff]  ;;  %s526_s0 = smov [#allocation9]  }
  0x33   :  { %396 = vmatpush3.bf16.xpose.msra.mxu0 %v395_v13  ;;  %421 = vmatprep.subr.bf16.mxu1 %v523_v0  ;;  %v284_v51 = vld [vmem:[%s629_s3] ss:$0 sm:$0xff]  ;;  %s274_s29 = sshll.u32 %s526_s0, 4  ;;  %s275_s29 = int_to_ptr.vmem [resolvable:$true] %s274_s29 }
  0x34   :  { %397 = vmatprep.subr.bf16.mxu0 %v523_v0  ;;  %v66_v52 = vmul.f32 %v284_v51, %v58_v50  ;;  %v285_v53 = vld [vmem:[%s630_s4] ss:$0 sm:$0xff]  ;;  %s491_s3 = scalar_lea.vmem %s275_s29, 128  ;;  %p496_p3 = scmp.lt.s32.totalorder %s275_s29, %s275_s29 }
  0x35   :  { %v286_v58 = vld [vmem:[%s631_s5] ss:$0 sm:$0xff]  ;;  %p492_p2 = scmp.ne.s32.totalorder %s275_s29, %s491_s3  ;;  %p497_p4 = scmp.lt.s32.totalorder %s491_s3, %s491_s3 }
  0x37   :  { %p498_p5 = por %p497_p4, %p496_p3 }
  0x39   :  { %p499_p6 = pnand %p498_p5, %p492_p2 }
  0x3a   :  { %423 = vmatpush3.bf16.xpose.msra.mxu1 %v422_v18 }
  0x3b   :  { %399 = vmatpush3.bf16.xpose.msra.mxu0 %v398_v19  ;;  %424 = vmatprep.subr.bf16.mxu1 %v523_v0 }
  0x3c   :  { %400 = vmatprep.subr.bf16.mxu0 %v523_v0 }
  0x42   :  { %426 = vmatpush3.bf16.xpose.msra.mxu1 %v425_v24 }
  0x43   :  { %402 = vmatpush3.bf16.xpose.msra.mxu0 %v401_v25  ;;  %427 = vmatprep.subr.bf16.mxu1 %v523_v0 }
  0x44   :  { %403 = vmatprep.subr.bf16.mxu0 %v523_v0 }
  0x4a   :  { %429 = vmatpush3.bf16.xpose.msra.mxu1 %v428_v30 }
  0x4b   :  { %405 = vmatpush3.bf16.xpose.msra.mxu0 %v404_v31  ;;  %430 = vmatprep.subr.bf16.mxu1 %v523_v0 }
  0x4c   :  { %406 = vmatprep.subr.bf16.mxu0 %v523_v0 }
  0x52   :  { %432 = vmatpush3.bf16.xpose.msra.mxu1 %v431_v36 }
  0x53   :  { %408 = vmatpush3.bf16.xpose.msra.mxu0 %v407_v37  ;;  %433 = vmatprep.subr.bf16.mxu1 %v523_v0 }
  0x54   :  { %409 = vmatprep.subr.bf16.mxu0 %v523_v0 }
  0x5a   :  { %435 = vmatpush3.bf16.xpose.msra.mxu1 %v434_v42 }
  0x5b   :  { %411 = vmatpush3.bf16.xpose.msra.mxu0 %v410_v43  ;;  %436 = vmatprep.subr.bf16.mxu1 %v523_v0 }
  0x5c   :  { %412 = vmatprep.subr.bf16.mxu0 %v523_v0 }
  0x62   :  { %438 = vmatpush3.bf16.xpose.msra.mxu1 %v437_v48 }
  0x63   :  { %414 = vmatpush3.bf16.xpose.msra.mxu0 %v413_v49 }
  0x69   :  { %389 = vmatmul.mubr.f32.vlgmr.msra.gmra.mrb[0].mxu1 %v66_v52 }
  0x6a   :  { %354 = vmatmul.mubr.f32.vlgmr.msra.gmra.mrb[0].mxu0 %v58_v50 }
 0x13c   :  { %v239_v54 = vpop.f32.mrb[0].mxu1 }
 0x13d   :  { %v257_v55 = vmul.f32 %v285_v53, %v239_v54  ;;  %v150_v56 = vpop.f32.mrb[0].mxu0  ;;  %v390_v57 = vpop.f32.mrb[1].mxu1 }
 0x13e   :  { %v355_v59 = vpop.f32.mrb[1].mxu0 }
 0x13f   :  { %v258_v60 = vadd.f32 %v257_v55, %v150_v56 }
 0x141   :  { %v266_v61 = vadd.f32 %v286_v58, %v258_v60 }
 0x143   :  { %267 = vst [vmem:[#allocation9] sm:$0xff] %v266_v61 }
 0x144   :  { %502 = shalt.err (!%p499_p6)
}
 0x145   :  { %s503_s7 = scalar_lea.hbm %s632_s6, 128 }
 0x146   :  { %p504_p7 = scmp.ne.s32.totalorder %s632_s6, %s503_s7  ;;  %p507_p8 = scmp.lt.u32.totalorder %s503_s7, %s632_s6 }
 0x148   :  { %p509_p9 = pnand %p507_p8, %p504_p7 }
 0x14a   :  { %512 = shalt.err (!%p509_p9)
}
 0x14b   :  { %277 = dma.vmem_to_hbm [thread:$0]  %s275_s29, 128, %s632_s6, [#allocation6]  }
 0x14c   :  { %517 = dma.done.wait [#allocation6], 128  }
 0x14d   :  { %518 = vsyncadd [#allocation6], 4294967168 }
 0x14e   :  { %281 = vsyncpa [#allocation5], 1 }
 0x14f   :  { %282 = vsyncpa [#allocation8], 1 }
 0x150   :  { %283 = vsyncpa [#allocation6], 1 }

</bundles_post_ra>
